<compile_context>
chip_gen: v6e
topology: v6e:2x2x1
jax: 0.10.0
libtpu: 0.0.40
codegen_flags: <defaults>
</compile_context>

<pallas_src>
import jax
import jax.numpy as jnp
import numpy as np
from jax.experimental import pallas as pl
from jax.experimental.pallas import tpu as pltpu


def _round_up(x: int, m: int) -> int:
    return ((x + m - 1) // m) * m


def neural_ode_kernel(x_ref, w1_ref, b1_ref, w2_ref, b2_ref, w3_ref, b3_ref, o_ref):
    # x_ref: (7, TB) — batch on lanes.  Weights are (out, in); biases (out, 1).
    x = x_ref[...]

    h1 = jnp.tanh(
        jnp.dot(w1_ref[...], x, preferred_element_type=jnp.float32) + b1_ref[...]
    )  # (50, TB)
    h2 = jnp.tanh(
        jnp.dot(w2_ref[...], h1, preferred_element_type=jnp.float32) + b2_ref[...]
    )  # (20, TB)
    out = jnp.dot(w3_ref[...], h2, preferred_element_type=jnp.float32) + b3_ref[...]

    o_ref[...] = out.astype(o_ref.dtype)  # (7, TB), lane-dense store


def neural_ode_forward(t, y, params, *, tb_max=1024):
    """y: (B, 1, 7) float32 -> (B, 1, 7) float32.  `t` is unused (as in PyTorch)."""
    del t
    w1, b1, w2, b2, w3, b3 = params
    B = y.shape[0]

    # Batch-on-lanes working layout: (7, B), padded to a multiple of TB lanes.
    x = y.reshape(B, 7).T
    TB = min(tb_max, _round_up(B, 128))
    Bp = _round_up(B, TB)
    if Bp != B:
        x = jnp.pad(x, ((0, 0), (0, Bp - B)))

    out = pl.pallas_call(
        neural_ode_kernel,
        out_shape=jax.ShapeDtypeStruct((7, Bp), jnp.float32),
        grid=(Bp // TB,),
        in_specs=[
            pl.BlockSpec((7, TB), lambda i: (0, i)),     # y tile walks the batch
            pl.BlockSpec((50, 7), lambda i: (0, 0)),     # weights/biases: constant
            pl.BlockSpec((50, 1), lambda i: (0, 0)),     # index_map -> DMA'd once,
            pl.BlockSpec((20, 50), lambda i: (0, 0)),    # stay VMEM-resident
            pl.BlockSpec((20, 1), lambda i: (0, 0)),
            pl.BlockSpec((7, 20), lambda i: (0, 0)),
            pl.BlockSpec((7, 1), lambda i: (0, 0)),
        ],
        out_specs=pl.BlockSpec((7, TB), lambda i: (0, i)),
        compiler_params=pltpu.CompilerParams(
            dimension_semantics=("parallel",),
        ),
    )(x, w1, b1, w2, b2, w3, b3)

    return out[:, :B].T.reshape(B, 1, 7)


def init_params(key):
    """Deterministic init matching the PyTorch module:
    weights ~ N(0, 0.5^2); biases ~ default Linear init U(-1/sqrt(fan_in), 1/sqrt(fan_in)).
    Weights stored as (out, in); biases as (out, 1)."""
    k = jax.random.split(key, 6)
    w1 = jax.random.normal(k[0], (50, 7), jnp.float32) * 0.5
    w2 = jax.random.normal(k[1], (20, 50), jnp.float32) * 0.5
    w3 = jax.random.normal(k[2], (7, 20), jnp.float32) * 0.5
    b1 = jax.random.uniform(k[3], (50, 1), jnp.float32, -1.0 / np.sqrt(7.0), 1.0 / np.sqrt(7.0))
    b2 = jax.random.uniform(k[4], (20, 1), jnp.float32, -1.0 / np.sqrt(50.0), 1.0 / np.sqrt(50.0))
    b3 = jax.random.uniform(k[5], (7, 1), jnp.float32, -1.0 / np.sqrt(20.0), 1.0 / np.sqrt(20.0))
    return (w1, b1, w2, b2, w3, b3)


def reference_forward(y, params):
    """Pure-JAX reference (PyTorch Linear convention: x @ W.T + b)."""
    w1, b1, w2, b2, w3, b3 = params
    B = y.shape[0]
    yf = y.reshape(B, 7)
    h1 = jnp.tanh(yf @ w1.T + b1.T)
    h2 = jnp.tanh(h1 @ w2.T + b2.T)
    out = h2 @ w3.T + b3.T
    return out.reshape(B, 1, 7)


if __name__ == "__main__":
    key = jax.random.PRNGKey(0)
    kp, ky = jax.random.split(key)
    params = init_params(kp)

    B = 8
    y = jax.random.uniform(ky, (B, 1, 7), jnp.float32, minval=0.1, maxval=2.0)
    t = jnp.float32(0.0)

    out = neural_ode_forward(t, y, params)
    out = jax.block_until_ready(out)

    ref = reference_forward(y, params)
    np.testing.assert_allclose(np.asarray(out), np.asarray(ref), rtol=1e-5, atol=1e-5)

    print("KERNEL_OK")
</pallas_src>

<mosaic_0001>
module attributes {stable_mosaic.version = 11 : i64} {
  func.func @neural_ode_kernel(%arg0: i32, %arg1: memref<7x128xf32, #tpu.memory_space<vmem>>, %arg2: memref<50x7xf32, #tpu.memory_space<vmem>>, %arg3: memref<50x1xf32, #tpu.memory_space<vmem>>, %arg4: memref<20x50xf32, #tpu.memory_space<vmem>>, %arg5: memref<20x1xf32, #tpu.memory_space<vmem>>, %arg6: memref<7x20xf32, #tpu.memory_space<vmem>>, %arg7: memref<7x1xf32, #tpu.memory_space<vmem>>, %arg8: memref<7x128xf32, #tpu.memory_space<vmem>>) attributes {dimension_semantics = [#tpu.dimension_semantics<parallel>], iteration_bounds = array<i64: 1>, scalar_prefetch = 0 : i64, scratch_operands = 0 : i64, tpu.core_type = #tpu.core_type<tc>, window_params = [{transform_indices = @transform_0, window_bounds = array<i64: 7, 128>}, {pipeline_mode = #tpu.pipeline_mode<synchronous>, transform_indices = @transform_1, window_bounds = array<i64: 50, 7>}, {pipeline_mode = #tpu.pipeline_mode<synchronous>, transform_indices = @transform_2, window_bounds = array<i64: 50, 1>}, {pipeline_mode = #tpu.pipeline_mode<synchronous>, transform_indices = @transform_3, window_bounds = array<i64: 20, 50>}, {pipeline_mode = #tpu.pipeline_mode<synchronous>, transform_indices = @transform_4, window_bounds = array<i64: 20, 1>}, {pipeline_mode = #tpu.pipeline_mode<synchronous>, transform_indices = @transform_5, window_bounds = array<i64: 7, 20>}, {pipeline_mode = #tpu.pipeline_mode<synchronous>, transform_indices = @transform_6, window_bounds = array<i64: 7, 1>}, {transform_indices = @transform_7, window_bounds = array<i64: 7, 128>}]} {
    %c0 = arith.constant 0 : index
    %c0_0 = arith.constant 0 : index
    %0 = vector.load %arg1[%c0, %c0_0] : memref<7x128xf32, #tpu.memory_space<vmem>>, vector<7x128xf32>
    %c0_1 = arith.constant 0 : index
    %c0_2 = arith.constant 0 : index
    %1 = vector.load %arg2[%c0_1, %c0_2] : memref<50x7xf32, #tpu.memory_space<vmem>>, vector<50x7xf32>
    %cst = arith.constant dense<0.000000e+00> : vector<50x128xf32>
    %2 = tpu.matmul %1, %0, %cst {dimension_numbers = #tpu.dot_dimension_numbers<[1], [0], [0], [1], [0, 0, 1, 1], [], []>} : vector<50x7xf32>, vector<7x128xf32>, vector<50x128xf32> -> vector<50x128xf32>
    %c0_3 = arith.constant 0 : index
    %c0_4 = arith.constant 0 : index
    %3 = vector.load %arg3[%c0_3, %c0_4] : memref<50x1xf32, #tpu.memory_space<vmem>>, vector<50x1xf32>
    %4 = vector.broadcast %3 : vector<50x1xf32> to vector<50x128xf32>
    %5 = arith.addf %2, %4 : vector<50x128xf32>
    %6 = math.tanh %5 : vector<50x128xf32>
    %c0_5 = arith.constant 0 : index
    %c0_6 = arith.constant 0 : index
    %7 = vector.load %arg4[%c0_5, %c0_6] : memref<20x50xf32, #tpu.memory_space<vmem>>, vector<20x50xf32>
    %cst_7 = arith.constant dense<0.000000e+00> : vector<20x128xf32>
    %8 = tpu.matmul %7, %6, %cst_7 {dimension_numbers = #tpu.dot_dimension_numbers<[1], [0], [0], [1], [0, 0, 1, 1], [], []>} : vector<20x50xf32>, vector<50x128xf32>, vector<20x128xf32> -> vector<20x128xf32>
    %c0_8 = arith.constant 0 : index
    %c0_9 = arith.constant 0 : index
    %9 = vector.load %arg5[%c0_8, %c0_9] : memref<20x1xf32, #tpu.memory_space<vmem>>, vector<20x1xf32>
    %10 = vector.broadcast %9 : vector<20x1xf32> to vector<20x128xf32>
    %11 = arith.addf %8, %10 : vector<20x128xf32>
    %12 = math.tanh %11 : vector<20x128xf32>
    %c0_10 = arith.constant 0 : index
    %c0_11 = arith.constant 0 : index
    %13 = vector.load %arg6[%c0_10, %c0_11] : memref<7x20xf32, #tpu.memory_space<vmem>>, vector<7x20xf32>
    %cst_12 = arith.constant dense<0.000000e+00> : vector<7x128xf32>
    %14 = tpu.matmul %13, %12, %cst_12 {dimension_numbers = #tpu.dot_dimension_numbers<[1], [0], [0], [1], [0, 0, 1, 1], [], []>} : vector<7x20xf32>, vector<20x128xf32>, vector<7x128xf32> -> vector<7x128xf32>
    %c0_13 = arith.constant 0 : index
    %c0_14 = arith.constant 0 : index
    %15 = vector.load %arg7[%c0_13, %c0_14] : memref<7x1xf32, #tpu.memory_space<vmem>>, vector<7x1xf32>
    %16 = vector.broadcast %15 : vector<7x1xf32> to vector<7x128xf32>
    %17 = arith.addf %14, %16 : vector<7x128xf32>
    %c0_15 = arith.constant 0 : index
    %c0_16 = arith.constant 0 : index
    %18 = vector.load %arg8[%c0_15, %c0_16] : memref<7x128xf32, #tpu.memory_space<vmem>>, vector<7x128xf32>
    tpu.vector_store %arg8[%c0_15, %c0_16], %17 {strides = array<i32>} : memref<7x128xf32, #tpu.memory_space<vmem>>, vector<7x128xf32>,
    return
  }
  func.func @transform_0(%arg0: i32) -> (i32, i32) {
    %c0_i32 = arith.constant 0 : i32
    %c0_i32_0 = arith.constant 0 : i32
    return %c0_i32, %arg0 : i32, i32
  }
  func.func @transform_1(%arg0: i32) -> (i32, i32) {
    %c0_i32 = arith.constant 0 : i32
    %c0_i32_0 = arith.constant 0 : i32
    %c0_i32_1 = arith.constant 0 : i32
    return %c0_i32, %c0_i32_0 : i32, i32
  }
  func.func @transform_2(%arg0: i32) -> (i32, i32) {
    %c0_i32 = arith.constant 0 : i32
    %c0_i32_0 = arith.constant 0 : i32
    %c0_i32_1 = arith.constant 0 : i32
    return %c0_i32, %c0_i32_0 : i32, i32
  }
  func.func @transform_3(%arg0: i32) -> (i32, i32) {
    %c0_i32 = arith.constant 0 : i32
    %c0_i32_0 = arith.constant 0 : i32
    %c0_i32_1 = arith.constant 0 : i32
    return %c0_i32, %c0_i32_0 : i32, i32
  }
  func.func @transform_4(%arg0: i32) -> (i32, i32) {
    %c0_i32 = arith.constant 0 : i32
    %c0_i32_0 = arith.constant 0 : i32
    %c0_i32_1 = arith.constant 0 : i32
    return %c0_i32, %c0_i32_0 : i32, i32
  }
  func.func @transform_5(%arg0: i32) -> (i32, i32) {
    %c0_i32 = arith.constant 0 : i32
    %c0_i32_0 = arith.constant 0 : i32
    %c0_i32_1 = arith.constant 0 : i32
    return %c0_i32, %c0_i32_0 : i32, i32
  }
  func.func @transform_6(%arg0: i32) -> (i32, i32) {
    %c0_i32 = arith.constant 0 : i32
    %c0_i32_0 = arith.constant 0 : i32
    %c0_i32_1 = arith.constant 0 : i32
    return %c0_i32, %c0_i32_0 : i32, i32
  }
  func.func @transform_7(%arg0: i32) -> (i32, i32) {
    %c0_i32 = arith.constant 0 : i32
    %c0_i32_0 = arith.constant 0 : i32
    return %c0_i32, %arg0 : i32, i32
  }
}

</mosaic_0001>

<bundles_post_ra>
// kernel: tpu_custom_call.1
= control target key start
LH: loop header
LB: loop body
LE: loop exit
PB: predicated region body
PF: predicated region fallthrough
CT: control target
= control target key end

     0   :  { %vm99_vm0 = vcmask 1046528   ;;  %v567_v2 = vmov 0.0   ;;  %vm568_vm1 = vmmov 0   ;;  %vm77_vm2 = vcmask 56320   ;;  %s723_s0 = inlined_call_operand.vmem [shape: f32[7,128], index: 0, kind: input, shape index: {}]   ;;  %s724_s1 = inlined_call_operand.vmem [shape: f32[50,7], index: 1, kind: input, shape index: {}]   ;;  %s725_s2 = inlined_call_operand.vmem [shape: f32[50,1], index: 2, kind: input, shape index: {}]   ;;  %s726_s3 = inlined_call_operand.vmem [shape: f32[20,50], index: 3, kind: input, shape index: {}]   ;;  %s727_s4 = inlined_call_operand.vmem [shape: f32[20,1], index: 4, kind: input, shape index: {}]   ;;  %s728_s5 = inlined_call_operand.vmem [shape: f32[7,20], index: 5, kind: input, shape index: {}]   ;;  %s729_s6 = inlined_call_operand.vmem [shape: f32[7,1], index: 6, kind: input, shape index: {}]   ;;  %s730_s7 = inlined_call_operand.hbm [shape: f32[7,128], index: 7, kind: output, shape index: {}]  }
   0x1   :  { %v27_v0 = vld [vmem:[%s723_s0] sm:$0x7f]  ;;  %464 = vmatprep.subr.mxu0 %v567_v2  ;;  %466 = vmatprep.mubr.msk.f32.mxu0 %vm568_vm1, %v567_v2  ;;  %v569_v3 = vmov 0   ;;  %v41_v4 = vld [vmem:[%s725_s2 + $0x30] sm:$0x3]  ;;  %v29_v6 = vld [vmem:[%s724_s1 + $0x8] sm:$0xff] }
   0x2   :  { %v28_v1 = vld [vmem:[%s724_s1] sm:$0xff]  ;;  %465 = vmatpush3.msk.msra.mxu0 %vm99_vm0, %v27_v0  ;;  %523 = vset.pattern.permute.xlu0 %v569_v3  ;;  %v40_v7 = vld [vmem:[%s725_s2 + $0x28] sm:$0xff]  ;;  %v38_v8 = vld [vmem:[%s725_s2 + $0x18] sm:$0xff] }
   0x3   :  { %467 = vmatmul.mubr.msk.f32.vlgmr.msra.gmra.mxu0 %vm77_vm2, %v28_v1  ;;  %524 = vset.pattern.permute.xlu1 %v569_v3  ;;  %v39_v5 = vld [vmem:[%s725_s2 + $0x20] sm:$0xff] }
   0x4   :  { %469 = vmatprep.mubr.msk.f32.mxu0 %vm568_vm1, %v567_v2  ;;  %74 = vperm.xlu0 %523, %v41_v4  }
   0x5   :  { %64 = vperm.xlu1 %524, %v39_v5   ;;  %487 = vmatprep.subr.mxu1 %v567_v2 }
   0x6   :  { %501 = vmatprep.mubr.msk.f32.mxu1 %vm568_vm1, %v567_v2 }
   0x7   :  { %12 = vsyncpa [#allocation3], 0  ;;  %470 = vmatmul.mubr.msk.f32.gmra.mxu0 %vm77_vm2, %v29_v6  ;;  %v30_v9 = vld [vmem:[%s724_s1 + $0x10] sm:$0xff]  ;;  %v36_v11 = vld [vmem:[%s725_s2 + $0x8] sm:$0xff]  ;;  %vm241_vm3 = vcmask 1041408   ;;  %vm231_vm4 = vcmask 408576  }
   0x8   :  { %472 = vmatprep.mubr.msk.f32.mxu0 %vm568_vm1, %v567_v2  ;;  %69 = vperm.xlu0 %523, %v40_v7   ;;  %v37_v10 = vld [vmem:[%s725_s2 + $0x10] sm:$0xff]  ;;  %v31_v12 = vld [vmem:[%s724_s1 + $0x18] sm:$0xff]  ;;  %v35_v13 = vld [vmem:[%s725_s2] sm:$0xff]  ;;  %vm339_vm5 = vcmask 1043456   ;;  %vm335_vm6 = vcmask 162816   ;;  %s570_s17 = smov [#allocation2]  }
   0x9   :  { %59 = vperm.xlu1 %524, %v38_v8   ;;  %v215_v14 = vld [vmem:[%s727_s4 + $0x10] sm:$0xf]  ;;  %v32_v15 = vld [vmem:[%s724_s1 + $0x20] sm:$0xff]  ;;  %v214_v16 = vld [vmem:[%s727_s4 + $0x8] sm:$0xff]  ;;  %s420_s18 = sshll.u32 %s570_s17, 4  ;;  %s421_s18 = int_to_ptr.vmem [resolvable:$true] %s420_s18 }
   0xa   :  { %v213_v17 = vld [vmem:[%s727_s4] sm:$0xff]  ;;  %v33_v18 = vld [vmem:[%s724_s1 + $0x28] sm:$0xff]  ;;  %v34_v20 = vld [vmem:[%s724_s1 + $0x30] sm:$0x3]  ;;  %s545_s19 = scalar_lea.vmem %s421_s18, 128  ;;  %p550_p1 = scmp.lt.s32.totalorder %s421_s18, %s421_s18 }
   0xb   :  { %473 = vmatmul.mubr.msk.f32.gmra.mxu0 %vm77_vm2, %v30_v9  ;;  %v329_v19 = vld [vmem:[%s729_s6] sm:$0x7f]  ;;  %v211_v57 = vld [vmem:[%s726_s3 + $0x8] sm:$0xff]  ;;  %v212_v58 = vld [vmem:[%s726_s3 + $0x10] sm:$0xf]  ;;  %p546_p0 = scmp.ne.s32.totalorder %s421_s18, %s545_s19  ;;  %p551_p2 = scmp.lt.s32.totalorder %s545_s19, %s545_s19 }
   0xc   :  { %475 = vmatprep.mubr.msk.f32.mxu0 %vm568_vm1, %v567_v2  ;;  %54 = vperm.xlu0 %523, %v37_v10   ;;  %v210_v55 = vld [vmem:[%s726_s3] sm:$0xff] }
   0xd   :  { %49 = vperm.xlu1 %524, %v36_v11   ;;  %v328_v10 = vld [vmem:[%s728_s5] sm:$0x7f]  ;;  %p552_p3 = por %p551_p2, %p550_p1 }
   0xf   :  { %476 = vmatmul.mubr.msk.f32.gmra.mxu0 %vm77_vm2, %v31_v12  ;;  %p553_p4 = pnand %p552_p3, %p546_p0 }
  0x10   :  { %478 = vmatprep.mubr.msk.f32.mxu0 %vm568_vm1, %v567_v2  ;;  %44 = vperm.xlu0 %523, %v35_v13  }
  0x11   :  { %228 = vperm.xlu1 %524, %v215_v14  }
  0x13   :  { %479 = vmatmul.mubr.msk.f32.gmra.mxu0 %vm77_vm2, %v32_v15 }
  0x14   :  { %481 = vmatprep.mubr.msk.f32.mxu0 %vm568_vm1, %v567_v2  ;;  %223 = vperm.xlu0 %523, %v214_v16  }
  0x15   :  { %218 = vperm.xlu1 %524, %v213_v17  }
  0x17   :  { %482 = vmatmul.mubr.msk.f32.gmra.mxu0 %vm77_vm2, %v33_v18 }
  0x18   :  { %484 = vmatprep.mubr.msk.f32.mxu0 %vm568_vm1, %v567_v2  ;;  %332 = vperm.xlu0 %523, %v329_v19  }
  0x1b   :  { %485 = vmatmul.mubr.msk.f32.gmra.mxu0 %vm77_vm2, %v34_v20 }
  0x7f   :  { %v75_v28 = vpop.permute.xlu0 %74 }
  0x80   :  { %v65_v31 = vpop.permute.xlu1 %64 }
  0x83   :  { %v70_v33 = vpop.permute.xlu0 %69 }
  0x84   :  { %v60_v36 = vpop.permute.xlu1 %59 }
  0x87   :  { %v55_v40 = vpop.permute.xlu0 %54 }
  0x88   :  { %v50_v44 = vpop.permute.xlu1 %49 }
  0x8b   :  { %v45_v46 = vpop.permute.xlu0 %44 }
  0x8c   :  { %v229_v61 = vpop.permute.xlu1 %228 }
  0x8f   :  { %v224_v0 = vpop.permute.xlu0 %223 }
  0x90   :  { %v219_v5 = vpop.permute.xlu1 %218 }
  0x93   :  { %v333_v12 = vpop.permute.xlu0 %332 }
  0xc3   :  { %v169_v21 = vpop.f32.mrf.mxu0 }
  0xc4   :  { %v170_v48 = vadd.f32 %v169_v21, %v45_v46 }
  0xc5   :  { %v468_v22 = vpop.f32.mrf.mxu0 }
  0xc7   :  { %v174_v23 = vpop.f32.mrf.mxu0 }
  0xc8   :  { %v175_v47 = vadd.f32 %v174_v23, %v50_v44 }
  0xc9   :  { %v471_v24 = vpop.f32.mrf.mxu0 }
  0xcb   :  { %v179_v25 = vpop.f32.mrf.mxu0 }
  0xcc   :  { %v180_v45 = vadd.f32 %v179_v25, %v55_v40 }
  0xcd   :  { %v474_v26 = vpop.f32.mrf.mxu0 }
  0xcf   :  { %v184_v27 = vpop.f32.mrf.mxu0 }
  0xd0   :  { %v185_v43 = vadd.f32 %v184_v27, %v60_v36 }
  0xd1   :  { %v477_v29 = vpop.f32.mrf.mxu0 }
  0xd3   :  { %v189_v30 = vpop.f32.mrf.mxu0 }
  0xd4   :  { %v190_v42 = vadd.f32 %v189_v30, %v65_v31 }
  0xd5   :  { %v480_v32 = vpop.f32.mrf.mxu0 }
  0xd7   :  { %v194_v34 = vpop.f32.mrf.mxu0 }
  0xd8   :  { %v195_v38 = vadd.f32 %v194_v34, %v70_v33 }
  0xd9   :  { %v483_v35 = vpop.f32.mrf.mxu0 }
  0xdb   :  { %v199_v37 = vpop.f32.mrf.mxu0 }
  0xdc   :  { %v200_v39 = vadd.f32 %v199_v37, %v75_v28 }
  0xdd   :  { %v486_v41 = vpop.f32.mrf.mxu0 }
  0xde   :  { %525 = vtanh.f32 %v200_v39 }
  0xdf   :  { %527 = vtanh.f32 %v195_v38 }
  0xe0   :  { %529 = vtanh.f32 %v190_v42 }
  0xe1   :  { %531 = vtanh.f32 %v185_v43 }
  0xe2   :  { %533 = vtanh.f32 %v180_v45 }
  0xe3   :  { %535 = vtanh.f32 %v175_v47 }
  0xe4   :  { %537 = vtanh.f32 %v170_v48 }
  0xeb   :  { %v526_v49 = vpop.eup %525 }
  0xec   :  { %488 = vmatpush3.msk.msra.mxu1 %vm241_vm3, %v526_v49  ;;  %v528_v50 = vpop.eup %527 }
  0xed   :  { %489 = vmatprep.subr.mxu1 %v567_v2  ;;  %v530_v51 = vpop.eup %529 }
  0xee   :  { %490 = vmatpush3.msra.mxu1 %v528_v50  ;;  %v532_v52 = vpop.eup %531 }
  0xef   :  { %491 = vmatprep.subr.mxu1 %v567_v2  ;;  %v534_v53 = vpop.eup %533 }
  0xf0   :  { %492 = vmatpush3.msra.mxu1 %v530_v51  ;;  %v536_v54 = vpop.eup %535 }
  0xf1   :  { %493 = vmatprep.subr.mxu1 %v567_v2  ;;  %v538_v56 = vpop.eup %537 }
  0xf2   :  { %494 = vmatpush3.msra.mxu1 %v532_v52 }
  0xf3   :  { %495 = vmatprep.subr.mxu1 %v567_v2 }
  0xf4   :  { %496 = vmatpush3.msra.mxu1 %v534_v53 }
  0xf5   :  { %497 = vmatprep.subr.mxu1 %v567_v2 }
  0xf6   :  { %498 = vmatpush3.msra.mxu1 %v536_v54 }
  0xf7   :  { %499 = vmatprep.subr.mxu1 %v567_v2 }
  0xf8   :  { %500 = vmatpush3.msra.mxu1 %v538_v56 }
  0xf9   :  { %502 = vmatmul.mubr.msk.f32.vlgmr.msra.gmra.mxu1 %vm231_vm4, %v210_v55  ;;  %510 = vmatprep.subr.mxu1 %v567_v2 }
  0xfa   :  { %504 = vmatprep.mubr.msk.f32.mxu1 %vm568_vm1, %v567_v2 }
  0xfd   :  { %505 = vmatmul.mubr.msk.f32.gmra.mxu1 %vm231_vm4, %v211_v57 }
  0xfe   :  { %507 = vmatprep.mubr.msk.f32.mxu1 %vm568_vm1, %v567_v2 }
 0x101   :  { %508 = vmatmul.mubr.msk.f32.gmra.mxu1 %vm231_vm4, %v212_v58 }
 0x102   :  { %516 = vmatprep.mubr.msk.f32.mxu1 %vm568_vm1, %v567_v2 }
 0x1b9   :  { %v311_v59 = vpop.f32.mrf.mxu1 }
 0x1ba   :  { %v312_v7 = vadd.f32 %v311_v59, %v219_v5 }
 0x1bb   :  { %v503_v60 = vpop.f32.mrf.mxu1 }
 0x1bd   :  { %v316_v62 = vpop.f32.mrf.mxu1 }
 0x1be   :  { %v317_v3 = vadd.f32 %v316_v62, %v224_v0 }
 0x1bf   :  { %v506_v63 = vpop.f32.mrf.mxu1 }
 0x1c1   :  { %v321_v1 = vpop.f32.mrf.mxu1 }
 0x1c2   :  { %v322_v4 = vadd.f32 %v321_v1, %v229_v61 }
 0x1c3   :  { %v509_v6 = vpop.f32.mrf.mxu1 }
 0x1c4   :  { %539 = vtanh.f32 %v322_v4 }
 0x1c5   :  { %541 = vtanh.f32 %v317_v3 }
 0x1c6   :  { %543 = vtanh.f32 %v312_v7 }
 0x1d1   :  { %v540_v8 = vpop.eup %539 }
 0x1d2   :  { %511 = vmatpush3.msk.msra.mxu1 %vm339_vm5, %v540_v8  ;;  %v542_v9 = vpop.eup %541 }
 0x1d3   :  { %512 = vmatprep.subr.mxu1 %v567_v2  ;;  %v544_v11 = vpop.eup %543 }
 0x1d4   :  { %513 = vmatpush3.msra.mxu1 %v542_v9 }
 0x1d5   :  { %514 = vmatprep.subr.mxu1 %v567_v2 }
 0x1d6   :  { %515 = vmatpush3.msra.mxu1 %v544_v11 }
 0x1d7   :  { %517 = vmatmul.mubr.msk.f32.vlgmr.msra.gmra.mxu1 %vm335_vm6, %v328_v10 }
 0x297   :  { %v409_v13 = vpop.f32.mrf.mxu1 }
 0x298   :  { %v410_v14 = vadd.f32 %v409_v13, %v333_v12 }
 0x299   :  { %v518_v15 = vpop.f32.mrf.mxu1 }
 0x29a   :  { %413 = vst [vmem:[#allocation2] sm:$0x7f] %v410_v14 }
 0x29b   :  { %556 = shalt.err (!%p553_p4)
}
 0x29c   :  { %423 = dma.vmem_to_hbm [thread:$0]  %s421_s18, 128, %s730_s7, [#allocation3]  }
 0x29d   :  { %565 = dma.done.wait [#allocation3], 128  }
 0x29e   :  { %566 = vsyncadd [#allocation3], 4294967168 }
 0x29f   :  { %427 = vsyncpa [#allocation3], 1 }

</bundles_post_ra>
